<compile_context>
chip_gen: v6e
topology: v6e:2x2x1
jax: 0.10.0
libtpu: 0.0.40
codegen_flags: <defaults>
</compile_context>

<pallas_src>
from functools import partial

import jax
import jax.numpy as jnp
from jax.experimental import pallas as pl
from jax.experimental.pallas import tpu as pltpu


LANES = 512                              # lane-dense last dim (multiple of 128)
TARGET_BLOCK_BYTES = 4 * 1024 * 1024     # ~4 MiB blocks
VMEM_LIMIT_BYTES = 32 * 1024 * 1024      # covers 2 in + 2 out buffers everywhere
PALLAS_MIN_BYTES = 256 * 1024            # below this, pure-JAX multiply fuses for free


def _round_up(a, m):
    return ((a + m - 1) // m) * m


def rescale_kernel(b_ref, x_ref, o_ref):
    # b_ref: SMEM scalar parameter, shape (1,)
    # x_ref / o_ref: VMEM tiles, shape (tile_r, LANES)
    scale = b_ref[0]                                   # hoist the scalar read once
    o_ref[...] = (scale * x_ref[...]).astype(o_ref.dtype)


@partial(jax.jit, static_argnames=("force_pallas",))
def rescale_forward(b, x, force_pallas=False):
    """Elementwise scale: yhat = b * x.  b has shape (1,), x is any shape."""
    orig_shape = x.shape
    n = x.size
    itemsize = x.dtype.itemsize

    # Small-input fast path: kernel launch would be pure overhead.
    if not force_pallas and n * itemsize < PALLAS_MIN_BYTES:
        return (b[0] * x).astype(x.dtype)

    # dtype-aware sublane unit: 8 for f32, 16 for bf16, 32 for int8/fp8.
    sublane = max(8, 32 // itemsize)

    # Flatten row-major (bitcast, free). Pad only when numel isn't a multiple
    # of LANES; otherwise no extra HBM pass at all.
    xf = x.reshape(-1)
    padded = (n % LANES) != 0
    if padded:
        n_pad = _round_up(n, LANES)
        xf = jnp.pad(xf, (0, n_pad - n))
    else:
        n_pad = n
    rows = n_pad // LANES
    x2 = xf.reshape(rows, LANES)

    # Row tile: ~TARGET_BLOCK_BYTES per block, multiple of the sublane unit.
    bytes_per_row = LANES * itemsize
    tile_r = max(sublane, (TARGET_BLOCK_BYTES // bytes_per_row) // sublane * sublane)

    # v7x megacore: if the tensor is bigger than a couple of sublane groups but
    # would fit in one block, split so the "parallel" grid has >= 2 steps.
    if rows > 2 * sublane:
        half = _round_up(pl.cdiv(rows, 2), sublane)
        tile_r = min(tile_r, half)

    if tile_r >= rows:
        tile_r = rows          # full-extent block: always a legal block shape
        grid = (1,)
    else:
        grid = (pl.cdiv(rows, tile_r),)   # ragged last block is bounds-masked

    call_kwargs = {}
    if padded:
        # x2 is a fresh intermediate -> XLA can donate it; scale happens in place.
        call_kwargs["input_output_aliases"] = {1: 0}

    out2 = pl.pallas_call(
        rescale_kernel,
        out_shape=jax.ShapeDtypeStruct(x2.shape, x2.dtype),
        grid=grid,
        in_specs=[
            pl.BlockSpec(memory_space=pltpu.MemorySpace.SMEM),    # scalar b
            pl.BlockSpec((tile_r, LANES), lambda i: (i, 0)),      # x row tile
        ],
        out_specs=pl.BlockSpec((tile_r, LANES), lambda i: (i, 0)),
        compiler_params=pltpu.CompilerParams(
            dimension_semantics=("parallel",),   # elementwise: no cross-tile dep
            vmem_limit_bytes=VMEM_LIMIT_BYTES,
        ),
        cost_estimate=pl.CostEstimate(
            flops=n_pad,
            transcendentals=0,
            bytes_accessed=2 * n_pad * itemsize,
        ),
        **call_kwargs,
    )(b, x2)

    out = out2.reshape(-1)
    if padded:
        out = out[:n]
    return out.reshape(orig_shape)


if __name__ == "__main__":
    key = jax.random.PRNGKey(0)

    # Parameter: b = torch.nn.Parameter(torch.Tensor([1])) -> scalar init 1.0
    b = jnp.ones((1,), dtype=jnp.float32)

    # Input: NCHW, batch=2, channels=4, spatial=16
    x = jax.random.normal(key, (2, 4, 16, 16), dtype=jnp.float32)

    # Exercise the Pallas kernel even at this small demo size.
    yhat = rescale_forward(b, x, force_pallas=True)
    yhat = jax.block_until_ready(yhat)

    # Reference check (pure JAX)
    ref = b[0] * x
    assert yhat.shape == x.shape
    assert yhat.dtype == x.dtype
    assert jnp.allclose(yhat, ref, atol=1e-6, rtol=1e-6)

    # Auto path (small-input fast path) for completeness.
    y2 = jax.block_until_ready(rescale_forward(b, x))
    assert jnp.allclose(y2, ref, atol=1e-6, rtol=1e-6)

    print("KERNEL_OK")
</pallas_src>

<mosaic_0001>
module attributes {stable_mosaic.version = 11 : i64} {
  func.func @rescale_kernel(%arg0: i32, %arg1: memref<1xf32, #tpu.memory_space<smem>>, %arg2: memref<4x512xf32, #tpu.memory_space<vmem>>, %arg3: memref<4x512xf32, #tpu.memory_space<vmem>>) attributes {dimension_semantics = [#tpu.dimension_semantics<parallel>], iteration_bounds = array<i64: 1>, scalar_prefetch = 0 : i64, scratch_operands = 0 : i64, tpu.core_type = #tpu.core_type<tc>, window_params = [{transform_indices = @transform_0, window_bounds = array<i64: 1>}, {transform_indices = @transform_1, window_bounds = array<i64: 4, 512>}, {transform_indices = @transform_2, window_bounds = array<i64: 4, 512>}]} {
    %c0 = arith.constant 0 : index
    %0 = memref.load %arg1[%c0] : memref<1xf32, #tpu.memory_space<smem>>
    %c0_0 = arith.constant 0 : index
    %c0_1 = arith.constant 0 : index
    %1 = vector.load %arg2[%c0_0, %c0_1] : memref<4x512xf32, #tpu.memory_space<vmem>>, vector<4x512xf32>
    %2 = vector.broadcast %0 : f32 to vector<4x512xf32>
    %3 = arith.mulf %2, %1 : vector<4x512xf32>
    %c0_2 = arith.constant 0 : index
    %c0_3 = arith.constant 0 : index
    %4 = vector.load %arg3[%c0_2, %c0_3] : memref<4x512xf32, #tpu.memory_space<vmem>>, vector<4x512xf32>
    tpu.vector_store %arg3[%c0_2, %c0_3], %3 {strides = array<i32>} : memref<4x512xf32, #tpu.memory_space<vmem>>, vector<4x512xf32>,
    return
  }
  func.func @transform_0(%arg0: i32) -> i32 {
    %c0_i32 = arith.constant 0 : i32
    %c0_i32_0 = arith.constant 0 : i32
    return %c0_i32 : i32
  }
  func.func @transform_1(%arg0: i32) -> (i32, i32) {
    %c0_i32 = arith.constant 0 : i32
    %c0_i32_0 = arith.constant 0 : i32
    return %arg0, %c0_i32 : i32, i32
  }
  func.func @transform_2(%arg0: i32) -> (i32, i32) {
    %c0_i32 = arith.constant 0 : i32
    %c0_i32_0 = arith.constant 0 : i32
    return %arg0, %c0_i32 : i32, i32
  }
}

</mosaic_0001>

<bundles_post_ra>
// kernel: rescale_forward.1
= control target key start
LH: loop header
LB: loop body
LE: loop exit
PB: predicated region body
PF: predicated region fallthrough
CT: control target
= control target key end

     0   :  { %s54_s0 = inlined_call_operand.<no memory space> [shape: f32[1], index: 0, kind: input, shape index: {}]   ;;  %s55_s1 = inlined_call_operand.vmem [shape: f32[4,512], index: 1, kind: input, shape index: {}]   ;;  %s56_s2 = inlined_call_operand.vmem [shape: f32[4,512], index: 2, kind: output, shape index: {}]  }
   0x1   :  { %v13_v0 = vld [vmem:[%s55_s1] sm:$0xff]  ;;  %v15_v1 = vstv %s54_s0  ;;  %v14_v2 = vld [vmem:[%s55_s1 + $0x8] sm:$0xff] }
   0x2   :  { %v16_v3 = vmul.f32 %v15_v1, %v13_v0  ;;  %v17_v4 = vmul.f32 %v15_v1, %v14_v2 }
   0x4   :  { %18 = vst [vmem:[%s56_s2] sm:$0xff] %v16_v3  ;;  %19 = vst [vmem:[%s56_s2 + $0x8] sm:$0xff] %v17_v4 }

</bundles_post_ra>
